<compile_context>
chip_gen: v7x
topology: tpu7x:2x2x1
jax: 0.10.0
libtpu: 0.0.40
codegen_flags: <defaults>
</compile_context>

<pallas_src>
import jax
import jax.numpy as jnp
from jax.experimental import pallas as pl
from jax.experimental.pallas import tpu as pltpu

CHN_MID = 32
EPS = 0.1
LEAKY_SLOPE = 0.2
N_FEAT = 6          # 5 real features + constant-1 (bias) channel


def _dist2logit_kernel(d0_ref, d1_ref,
                       w1t_ref, w2t_ref, b2_ref, w3t_ref, b3_ref,
                       o_ref):
    """One (G, tile_l) pixel block: feats -> 3 packed matmuls -> sigmoid."""
    d0 = d0_ref[...]                                     # (G, T) f32
    d1 = d1_ref[...]                                     # (G, T) f32

    # Ratio features via EUP approx reciprocal (eps=0.1 keeps it well
    # conditioned); all elementwise math stays f32.
    r0 = d0 * pl.reciprocal(d1 + EPS, approx=True)
    r1 = d1 * pl.reciprocal(d0 + EPS, approx=True)

    # Channel-major feature block (6G, T); each channel is a dense (G, T)
    # sublane block, so the concat is pure vreg stacking (no scratch, no
    # masked row stores).  The constant-1 block carries the layer-1 bias.
    feats = jnp.concatenate(
        [d0, d1, d0 - d1, r0, r1, jnp.ones_like(d0)], axis=0
    ).astype(w1t_ref.dtype)                              # (6G, T) bf16

    # Layer 1: (32G, 6G) @ (6G, T) -> (32G, T); bias folded via ones channel.
    h1 = jnp.dot(w1t_ref[...], feats, preferred_element_type=jnp.float32)
    h1 = jnp.maximum(h1, LEAKY_SLOPE * h1).astype(w2t_ref.dtype)   # LeakyReLU

    # Layer 2: (32G, 32G) @ (32G, T) -> (32G, T); bias + LeakyReLU + cast fused.
    h2 = jnp.dot(w2t_ref[...], h1, preferred_element_type=jnp.float32) \
        + b2_ref[...]
    h2 = jnp.maximum(h2, LEAKY_SLOPE * h2).astype(w3t_ref.dtype)   # LeakyReLU

    # Layer 3: (G, 32G) @ (32G, T) -> (G, T), then Sigmoid.
    h3 = jnp.dot(w3t_ref[...], h2, preferred_element_type=jnp.float32) \
        + b3_ref[...]
    o_ref[...] = jax.nn.sigmoid(h3).astype(o_ref.dtype)


def _round_up(x, m):
    return ((x + m - 1) // m) * m


def _default_group():
    """Pixel-group factor: 32*G should match the MXU width (256 on v6e/v7x,
    128 on v5e).  Falls back to 8 (still correct on v5e, just slower)."""
    try:
        kind = jax.devices()[0].device_kind.lower()
        if "v5 lite" in kind or "v5lite" in kind or "v5e" in kind:
            return 4
    except Exception:
        pass
    return 8


def _pack_params(params, group, mxu_dtype=jnp.bfloat16):
    """Repack reference-layout params into block-diagonal (W (x) I_G) layout.

    Reference layout (PyTorch Conv2d(Cin, Cout, 1) transposed):
      w1 (5, 32), b1 (1, 32), w2 (32, 32), b2 (1, 32), w3 (32, 1), b3 (1, 1).
    Packed activations are channel-major with the group index innermost:
      row c*G + g  <->  channel c of pixel-group g.
    """
    w1, b1, w2, b2, w3, b3 = params
    eye = jnp.eye(group, dtype=jnp.float32)
    # Layer 1: bias appended as the 6th input channel (matches ones channel).
    w1_aug = jnp.concatenate([w1.T, b1.T], axis=1)              # (32, 6)
    w1t = jnp.kron(w1_aug, eye).astype(mxu_dtype)               # (32G, 6G)
    w2t = jnp.kron(w2.T, eye).astype(mxu_dtype)                 # (32G, 32G)
    b2c = jnp.repeat(b2.T, group, axis=0).astype(jnp.float32)   # (32G, 1)
    w3t = jnp.kron(w3.T, eye).astype(mxu_dtype)                 # (G, 32G)
    b3c = jnp.broadcast_to(b3.reshape(1, 1),
                           (group, 1)).astype(jnp.float32)      # (G, 1)
    return w1t, w2t, b2c, w3t, b3c


def dist2logit_forward(d0_nchw, d1_nchw, params, *, group=None, max_tile_l=2048):
    """d0, d1: (N, 1, H, W) float32. Returns (N, 1, H, W) float32 in [0, 1]."""
    if group is None:
        group = _default_group()
    G = group
    w1t, w2t, b2c, w3t, b3c = _pack_params(params, G)

    N, C, H, W = d0_nchw.shape
    assert C == 1
    P = N * H * W

    # Lanes needed per group row.
    L = pl.cdiv(P, G)
    # Adaptive lane tile: multiple of 128, <= max_tile_l, and (for v7x megacore
    # sharding of the "parallel" axis) at least 2 grid steps when L is large
    # enough.  max_tile_l=2048 keeps the (32G, tile) f32 intermediates a few
    # MiB — safe inside every chip's default scoped-VMEM limit.
    tile_l = min(max_tile_l, _round_up(L, 128))
    if L > 128:
        tile_l = min(tile_l, _round_up(pl.cdiv(L, 2), 128))
    tile_l = max(tile_l, 128)

    L_pad = _round_up(L, tile_l)
    P_pad = G * L_pad

    # Flat pixel p maps to (g, t) = (p // L_pad, p % L_pad); zero padding is
    # harmless (0/(0+eps)=0, padded outputs are sliced off).
    d0 = d0_nchw.reshape(-1).astype(jnp.float32)
    d1 = d1_nchw.reshape(-1).astype(jnp.float32)
    if P_pad != P:
        d0 = jnp.pad(d0, (0, P_pad - P))
        d1 = jnp.pad(d1, (0, P_pad - P))
    d0 = d0.reshape(G, L_pad)
    d1 = d1.reshape(G, L_pad)

    grid = (L_pad // tile_l,)
    pix_spec = pl.BlockSpec((G, tile_l), lambda i: (0, i))
    const = lambda shape: pl.BlockSpec(shape, lambda i: (0, 0))

    out = pl.pallas_call(
        _dist2logit_kernel,
        out_shape=jax.ShapeDtypeStruct((G, L_pad), jnp.float32),
        grid_spec=pltpu.PrefetchScalarGridSpec(
            num_scalar_prefetch=0,
            grid=grid,
            in_specs=[
                pix_spec,            # d0
                pix_spec,            # d1
                const(w1t.shape),    # (32G, 6G) block-diag, bias folded
                const(w2t.shape),    # (32G, 32G) block-diag
                const(b2c.shape),    # (32G, 1)
                const(w3t.shape),    # (G, 32G) block-diag
                const(b3c.shape),    # (G, 1)
            ],
            out_specs=pix_spec,
        ),
        compiler_params=pltpu.CompilerParams(
            dimension_semantics=("parallel",)),
    )(d0, d1, w1t, w2t, b2c, w3t, b3c)

    return out.reshape(P_pad)[:P].reshape(N, 1, H, W)


def init_params(key):
    """Deterministic synthetic weights matching Conv2d(5,32,1), Conv2d(32,32,1),
    Conv2d(32,1,1).  PyTorch weight layout is (Cout, Cin, 1, 1); we store the
    transposed (Cin, Cout) matrices used by the per-pixel matmul reference."""
    ks = jax.random.split(key, 6)
    w1 = 0.1 * jax.random.normal(ks[0], (5, CHN_MID), jnp.float32)
    b1 = 0.1 * jax.random.normal(ks[1], (1, CHN_MID), jnp.float32)
    w2 = 0.1 * jax.random.normal(ks[2], (CHN_MID, CHN_MID), jnp.float32)
    b2 = 0.1 * jax.random.normal(ks[3], (1, CHN_MID), jnp.float32)
    w3 = 0.1 * jax.random.normal(ks[4], (CHN_MID, 1), jnp.float32)
    b3 = 0.1 * jax.random.normal(ks[5], (1, 1), jnp.float32)
    return (w1, b1, w2, b2, w3, b3)


def _reference(d0, d1, params, eps=EPS):
    """Pure-JAX f32 reference of the PyTorch forward (NCHW)."""
    w1, b1, w2, b2, w3, b3 = params
    N, _, H, W = d0.shape
    x = jnp.concatenate(
        [d0, d1, d0 - d1, d0 / (d1 + eps), d1 / (d0 + eps)], axis=1)   # (N,5,H,W)
    x = x.transpose(0, 2, 3, 1).reshape(-1, 5)                          # (P,5)
    h = x @ w1 + b1
    h = jnp.where(h >= 0, h, LEAKY_SLOPE * h)
    h = h @ w2 + b2
    h = jnp.where(h >= 0, h, LEAKY_SLOPE * h)
    h = h @ w3 + b3
    h = jax.nn.sigmoid(h)
    return h.reshape(N, H, W, 1).transpose(0, 3, 1, 2)


if __name__ == "__main__":
    key = jax.random.PRNGKey(0)
    kd0, kd1, kd2, kd3, kp = jax.random.split(key, 5)
    params = init_params(kp)

    # Small test (single grid step).  Distances are non-negative in LPIPS.
    N, H, W = 2, 16, 16
    d0 = jnp.abs(jax.random.normal(kd0, (N, 1, H, W), jnp.float32))
    d1 = jnp.abs(jax.random.normal(kd1, (N, 1, H, W), jnp.float32))
    out = jax.block_until_ready(dist2logit_forward(d0, d1, params))
    ref = _reference(d0, d1, params)
    assert out.shape == (N, 1, H, W)
    # bf16 MXU operands (f32 accumulation) loosen accuracy vs the f32
    # reference; sigmoid outputs agree to ~1e-2 absolute typically.
    err = jnp.max(jnp.abs(out - ref))
    assert err < 4e-2, f"small-test mismatch vs reference: max abs err {err}"

    # Larger test: exercises the multi-tile grid, the 'parallel' axis split
    # and the P_pad > P tail slice (P = 3*63*63 = 11907, not a tile multiple).
    N2, H2, W2 = 3, 63, 63
    d0b = jnp.abs(jax.random.normal(kd2, (N2, 1, H2, W2), jnp.float32))
    d1b = jnp.abs(jax.random.normal(kd3, (N2, 1, H2, W2), jnp.float32))
    outb = jax.block_until_ready(dist2logit_forward(d0b, d1b, params))
    refb = _reference(d0b, d1b, params)
    assert outb.shape == (N2, 1, H2, W2)
    errb = jnp.max(jnp.abs(outb - refb))
    assert errb < 4e-2, f"large-test mismatch vs reference: max abs err {errb}"

    print("KERNEL_OK")
</pallas_src>

<mosaic_0001>
module attributes {stable_mosaic.version = 11 : i64} {
  func.func @_dist2logit_kernel(%arg0: i32, %arg1: memref<8x128xf32, #tpu.memory_space<vmem>>, %arg2: memref<8x128xf32, #tpu.memory_space<vmem>>, %arg3: memref<256x48xbf16, #tpu.memory_space<vmem>>, %arg4: memref<256x256xbf16, #tpu.memory_space<vmem>>, %arg5: memref<256x1xf32, #tpu.memory_space<vmem>>, %arg6: memref<8x256xbf16, #tpu.memory_space<vmem>>, %arg7: memref<8x1xf32, #tpu.memory_space<vmem>>, %arg8: memref<8x128xf32, #tpu.memory_space<vmem>>) attributes {dimension_semantics = [#tpu.dimension_semantics<parallel>], iteration_bounds = array<i64: 1>, scalar_prefetch = 0 : i64, scratch_operands = 0 : i64, tpu.core_type = #tpu.core_type<tc>, window_params = [{transform_indices = @transform_0, window_bounds = array<i64: 8, 128>}, {transform_indices = @transform_1, window_bounds = array<i64: 8, 128>}, {pipeline_mode = #tpu.pipeline_mode<synchronous>, transform_indices = @transform_2, window_bounds = array<i64: 256, 48>}, {pipeline_mode = #tpu.pipeline_mode<synchronous>, transform_indices = @transform_3, window_bounds = array<i64: 256, 256>}, {pipeline_mode = #tpu.pipeline_mode<synchronous>, transform_indices = @transform_4, window_bounds = array<i64: 256, 1>}, {pipeline_mode = #tpu.pipeline_mode<synchronous>, transform_indices = @transform_5, window_bounds = array<i64: 8, 256>}, {pipeline_mode = #tpu.pipeline_mode<synchronous>, transform_indices = @transform_6, window_bounds = array<i64: 8, 1>}, {transform_indices = @transform_7, window_bounds = array<i64: 8, 128>}]} {
    %c0 = arith.constant 0 : index
    %c0_0 = arith.constant 0 : index
    %0 = vector.load %arg1[%c0, %c0_0] : memref<8x128xf32, #tpu.memory_space<vmem>>, vector<8x128xf32>
    %c0_1 = arith.constant 0 : index
    %c0_2 = arith.constant 0 : index
    %1 = vector.load %arg2[%c0_1, %c0_2] : memref<8x128xf32, #tpu.memory_space<vmem>>, vector<8x128xf32>
    %cst = arith.constant 1.000000e-01 : f32
    %2 = vector.broadcast %cst : f32 to vector<8x128xf32>
    %3 = arith.addf %1, %2 : vector<8x128xf32>
    %4 = tpu.reciprocal %3 {approx = true} : vector<8x128xf32> -> vector<8x128xf32>
    %5 = arith.mulf %0, %4 : vector<8x128xf32>
    %cst_3 = arith.constant 1.000000e-01 : f32
    %6 = vector.broadcast %cst_3 : f32 to vector<8x128xf32>
    %7 = arith.addf %0, %6 : vector<8x128xf32>
    %8 = tpu.reciprocal %7 {approx = true} : vector<8x128xf32> -> vector<8x128xf32>
    %9 = arith.mulf %1, %8 : vector<8x128xf32>
    %10 = arith.subf %0, %1 : vector<8x128xf32>
    %cst_4 = arith.constant 1.000000e+00 : f32
    %11 = vector.broadcast %cst_4 : f32 to vector<8x128xf32>
    %12 = tpu.concatenate %0, %1, %10, %5, %9, %11 in 0 : vector<8x128xf32>, vector<8x128xf32>, vector<8x128xf32>, vector<8x128xf32>, vector<8x128xf32>, vector<8x128xf32> -> vector<48x128xf32>
    %13 = arith.truncf %12 : vector<48x128xf32> to vector<48x128xbf16>
    %c0_5 = arith.constant 0 : index
    %c0_6 = arith.constant 0 : index
    %14 = vector.load %arg3[%c0_5, %c0_6] : memref<256x48xbf16, #tpu.memory_space<vmem>>, vector<256x48xbf16>
    %cst_7 = arith.constant dense<0.000000e+00> : vector<256x128xf32>
    %15 = tpu.matmul %14, %13, %cst_7 {dimension_numbers = #tpu.dot_dimension_numbers<[1], [0], [0], [1], [0, 0, 1, 1], [], []>} : vector<256x48xbf16>, vector<48x128xbf16>, vector<256x128xf32> -> vector<256x128xf32>
    %cst_8 = arith.constant 2.000000e-01 : f32
    %16 = vector.broadcast %cst_8 : f32 to vector<256x128xf32>
    %17 = arith.mulf %16, %15 : vector<256x128xf32>
    %18 = arith.maximumf %15, %17 : vector<256x128xf32>
    %19 = arith.truncf %18 : vector<256x128xf32> to vector<256x128xbf16>
    %c0_9 = arith.constant 0 : index
    %c0_10 = arith.constant 0 : index
    %20 = vector.load %arg4[%c0_9, %c0_10] : memref<256x256xbf16, #tpu.memory_space<vmem>>, vector<256x256xbf16>
    %cst_11 = arith.constant dense<0.000000e+00> : vector<256x128xf32>
    %21 = tpu.matmul %20, %19, %cst_11 {dimension_numbers = #tpu.dot_dimension_numbers<[1], [0], [0], [1], [0, 0, 1, 1], [], []>} : vector<256x256xbf16>, vector<256x128xbf16>, vector<256x128xf32> -> vector<256x128xf32>
    %c0_12 = arith.constant 0 : index
    %c0_13 = arith.constant 0 : index
    %22 = vector.load %arg5[%c0_12, %c0_13] : memref<256x1xf32, #tpu.memory_space<vmem>>, vector<256x1xf32>
    %23 = vector.broadcast %22 : vector<256x1xf32> to vector<256x128xf32>
    %24 = arith.addf %21, %23 : vector<256x128xf32>
    %cst_14 = arith.constant 2.000000e-01 : f32
    %25 = vector.broadcast %cst_14 : f32 to vector<256x128xf32>
    %26 = arith.mulf %25, %24 : vector<256x128xf32>
    %27 = arith.maximumf %24, %26 : vector<256x128xf32>
    %28 = arith.truncf %27 : vector<256x128xf32> to vector<256x128xbf16>
    %c0_15 = arith.constant 0 : index
    %c0_16 = arith.constant 0 : index
    %29 = vector.load %arg6[%c0_15, %c0_16] : memref<8x256xbf16, #tpu.memory_space<vmem>>, vector<8x256xbf16>
    %cst_17 = arith.constant dense<0.000000e+00> : vector<8x128xf32>
    %30 = tpu.matmul %29, %28, %cst_17 {dimension_numbers = #tpu.dot_dimension_numbers<[1], [0], [0], [1], [0, 0, 1, 1], [], []>} : vector<8x256xbf16>, vector<256x128xbf16>, vector<8x128xf32> -> vector<8x128xf32>
    %c0_18 = arith.constant 0 : index
    %c0_19 = arith.constant 0 : index
    %31 = vector.load %arg7[%c0_18, %c0_19] : memref<8x1xf32, #tpu.memory_space<vmem>>, vector<8x1xf32>
    %32 = vector.broadcast %31 : vector<8x1xf32> to vector<8x128xf32>
    %33 = arith.addf %30, %32 : vector<8x128xf32>
    %34 = arith.negf %33 : vector<8x128xf32>
    %35 = math.exp %34 : vector<8x128xf32>
    %cst_20 = arith.constant 1.000000e+00 : f32
    %36 = vector.broadcast %cst_20 : f32 to vector<8x128xf32>
    %37 = arith.addf %36, %35 : vector<8x128xf32>
    %38 = arith.divf %36, %37 : vector<8x128xf32>
    %c0_21 = arith.constant 0 : index
    %c0_22 = arith.constant 0 : index
    %39 = vector.load %arg8[%c0_21, %c0_22] : memref<8x128xf32, #tpu.memory_space<vmem>>, vector<8x128xf32>
    tpu.vector_store %arg8[%c0_21, %c0_22], %38 {strides = array<i32>} : memref<8x128xf32, #tpu.memory_space<vmem>>, vector<8x128xf32>,
    return
  }
  func.func @transform_0(%arg0: i32) -> (i32, i32) {
    %c0_i32 = arith.constant 0 : i32
    %c0_i32_0 = arith.constant 0 : i32
    return %c0_i32, %arg0 : i32, i32
  }
  func.func @transform_1(%arg0: i32) -> (i32, i32) {
    %c0_i32 = arith.constant 0 : i32
    %c0_i32_0 = arith.constant 0 : i32
    return %c0_i32, %arg0 : i32, i32
  }
  func.func @transform_2(%arg0: i32) -> (i32, i32) {
    %c0_i32 = arith.constant 0 : i32
    %c0_i32_0 = arith.constant 0 : i32
    %c0_i32_1 = arith.constant 0 : i32
    return %c0_i32, %c0_i32_0 : i32, i32
  }
  func.func @transform_3(%arg0: i32) -> (i32, i32) {
    %c0_i32 = arith.constant 0 : i32
    %c0_i32_0 = arith.constant 0 : i32
    %c0_i32_1 = arith.constant 0 : i32
    return %c0_i32, %c0_i32_0 : i32, i32
  }
  func.func @transform_4(%arg0: i32) -> (i32, i32) {
    %c0_i32 = arith.constant 0 : i32
    %c0_i32_0 = arith.constant 0 : i32
    %c0_i32_1 = arith.constant 0 : i32
    return %c0_i32, %c0_i32_0 : i32, i32
  }
  func.func @transform_5(%arg0: i32) -> (i32, i32) {
    %c0_i32 = arith.constant 0 : i32
    %c0_i32_0 = arith.constant 0 : i32
    %c0_i32_1 = arith.constant 0 : i32
    return %c0_i32, %c0_i32_0 : i32, i32
  }
  func.func @transform_6(%arg0: i32) -> (i32, i32) {
    %c0_i32 = arith.constant 0 : i32
    %c0_i32_0 = arith.constant 0 : i32
    %c0_i32_1 = arith.constant 0 : i32
    return %c0_i32, %c0_i32_0 : i32, i32
  }
  func.func @transform_7(%arg0: i32) -> (i32, i32) {
    %c0_i32 = arith.constant 0 : i32
    %c0_i32_0 = arith.constant 0 : i32
    return %c0_i32, %arg0 : i32, i32
  }
}

</mosaic_0001>

<bundles_post_ra>
// kernel: tpu_custom_call.1
= control target key start
LH: loop header
LB: loop body
LE: loop exit
PB: predicated region body
PF: predicated region fallthrough
CT: control target
= control target key end

     0   :  { %vm152_vm0 = vcmask 392192   ;;  %v1519_v12 = vmov 1.0   ;;  %s1967_s0 = inlined_call_operand.vmem [shape: f32[8,128], index: 0, kind: input, shape index: {}]   ;;  %s1968_s1 = inlined_call_operand.vmem [shape: f32[8,128], index: 1, kind: input, shape index: {}]   ;;  %s1969_s2 = inlined_call_operand.vmem [shape: bf16[256,48], index: 2, kind: input, shape index: {}]   ;;  %s1970_s3 = inlined_call_operand.vmem [shape: bf16[256,256], index: 3, kind: input, shape index: {}]   ;;  %s1971_s4 = inlined_call_operand.vmem [shape: f32[256,1], index: 4, kind: input, shape index: {}]   ;;  %s1972_s5 = inlined_call_operand.vmem [shape: bf16[8,256], index: 5, kind: input, shape index: {}]   ;;  %s1973_s6 = inlined_call_operand.vmem [shape: f32[8,1], index: 6, kind: input, shape index: {}]   ;;  %s1974_s7 = inlined_call_operand.hbm [shape: f32[8,128], index: 7, kind: output, shape index: {}]  }
   0x1   :  { %v28_v0 = vld [vmem:[%s1967_s0] sm:$0xff]  ;;  %v1422_v14 = vld [vmem:[%s1969_s2 + $0x8] sm:$0xff]   ;;  %v1423_v15 = vld [vmem:[%s1969_s2 + $0x10] sm:$0xff]  }
   0x2   :  { %v29_v1 = vld [vmem:[%s1968_s1] sm:$0xff]  ;;  %v33_v3 = vadd.f32 0.1, %v28_v0 }
   0x3   :  { %v30_v2 = vadd.f32 0.1, %v29_v1  ;;  %v37_v4 = vpack.c.bf16 %v29_v1, %v28_v0  ;;  %v1421_v5 = vld [vmem:[%s1969_s2] sm:$0xff]   ;;  %v36_v6 = vsub.f32 %v28_v0, %v29_v1 }
   0x4   :  { %1368 = vmatprep.mubr.msk.bf16.mxu0 %vm152_vm0, %v1421_v5 }
   0x5   :  { %1487 = vrcp.f32 %v30_v2  ;;  %1362 = vmatprep.subr.bf16.mxu0 %v37_v4 }
   0x6   :  { %1489 = vrcp.f32 %v33_v3  ;;  %1363 = vmatpush3.bf16.msra.mxu0 %v37_v4 }
   0xf   :  { %v1488_v7 = vpop.eup %1487 }
  0x10   :  { %v1490_v8 = vpop.eup %1489  ;;  %v32_v9 = vmul.f32 %v1488_v7, %v28_v0 }
  0x11   :  { %v35_v10 = vmul.f32 %v1490_v8, %v29_v1 }
  0x12   :  { %v38_v11 = vpack.c.bf16 %v32_v9, %v36_v6 }
  0x13   :  { %v39_v13 = vpack.c.bf16 %v1519_v12, %v35_v10 }
  0x14   :  { %1364 = vmatprep.subr.bf16.mxu0 %v38_v11 }
  0x15   :  { %1365 = vmatpush3.bf16.msra.mxu0 %v38_v11 }
  0x16   :  { %1366 = vmatprep.subr.bf16.mxu0 %v39_v13 }
  0x19   :  { %1367 = vmatpush3.bf16.msra.mxu0 %v39_v13 }
  0x1c   :  { %1369 = vmatmul.mubr.msk.bf16.vlgmr.msra.gmra.mrb[0].mxu0 %vm152_vm0, %v1422_v14 }
  0x1d   :  { %1372 = vmatprep.mubr.msk.bf16.mxu0 %vm152_vm0, %v1423_v15 }
  0x1e   :  { %12 = vsyncpa [#allocation3], 0  ;;  %v1424_v16 = vld [vmem:[%s1969_s2 + $0x18] sm:$0xff]   ;;  %v1425_v17 = vld [vmem:[%s1969_s2 + $0x20] sm:$0xff]   ;;  %v1520_v33 = vmov 0  }
  0x1f   :  { %v1426_v18 = vld [vmem:[%s1969_s2 + $0x28] sm:$0xff]   ;;  %v1427_v19 = vld [vmem:[%s1969_s2 + $0x30] sm:$0xff]   ;;  %v1428_v20 = vld [vmem:[%s1969_s2 + $0x38] sm:$0xff]   ;;  %1419 = vset.pattern.permute.xlu0 %v1520_v33  ;;  %1420 = vset.pattern.permute.xlu1 %v1520_v33 }
  0x20   :  { %v1429_v21 = vld [vmem:[%s1969_s2 + $0x40] sm:$0xff]   ;;  %v1430_v22 = vld [vmem:[%s1969_s2 + $0x48] sm:$0xff]   ;;  %v1431_v23 = vld [vmem:[%s1969_s2 + $0x50] sm:$0xff]  }
  0x21   :  { %v1432_v24 = vld [vmem:[%s1969_s2 + $0x58] sm:$0xff]   ;;  %v1433_v25 = vld [vmem:[%s1969_s2 + $0x60] sm:$0xff]   ;;  %v1434_v26 = vld [vmem:[%s1969_s2 + $0x68] sm:$0xff]  }
  0x22   :  { %v1435_v27 = vld [vmem:[%s1969_s2 + $0x70] sm:$0xff]   ;;  %v1436_v28 = vld [vmem:[%s1969_s2 + $0x78] sm:$0xff]   ;;  %v1439_v29 = vld [vmem:[%s1970_s3 + $0x44] ss:$8 sps:$4 sm:$0xff]  }
  0x23   :  { %890 = vmatprep.mubr.bf16.mxu1 %v1439_v29  ;;  %v1442_v30 = vld [vmem:[%s1970_s3 + $0x4] ss:$8 sps:$4 sm:$0xff]   ;;  %v492_v41 = vld [vmem:[%s1971_s4 + $0x90] sm:$0xff]  ;;  %v493_v45 = vld [vmem:[%s1971_s4 + $0x98] sm:$0xff] }
  0x24   :  { %1373 = vmatmul.mubr.msk.bf16.gmra.mrb[4].mxu0 %vm152_vm0, %v1424_v16  ;;  %v490_v31 = vld [vmem:[%s1971_s4 + $0x80] sm:$0xff]  ;;  %v491_v34 = vld [vmem:[%s1971_s4 + $0x88] sm:$0xff]  ;;  %v476_v48 = vld [vmem:[%s1971_s4 + $0x10] sm:$0xff] }
  0x25   :  { %1376 = vmatprep.mubr.msk.bf16.mxu0 %vm152_vm0, %v1425_v17  ;;  %v474_v32 = vld [vmem:[%s1971_s4] sm:$0xff]  ;;  %588 = vperm.xlu0 %1419, %v490_v31   ;;  %v475_v40 = vld [vmem:[%s1971_s4 + $0x8] sm:$0xff]  ;;  %v477_v58 = vld [vmem:[%s1971_s4 + $0x18] sm:$0xff] }
  0x26   :  { %508 = vperm.xlu1 %1420, %v474_v32   ;;  %v494_v59 = vld [vmem:[%s1971_s4 + $0xa0] sm:$0xff]  ;;  %v495_v63 = vld [vmem:[%s1971_s4 + $0xa8] sm:$0xff]  ;;  %v496_v13 = vld [vmem:[%s1971_s4 + $0xb0] sm:$0xff] }
  0x27   :  { %v478_v2 = vld [vmem:[%s1971_s4 + $0x20] sm:$0xff]  ;;  %v479_v12 = vld [vmem:[%s1971_s4 + $0x28] sm:$0xff]  ;;  %v497_v17 = vld [vmem:[%s1971_s4 + $0xb8] sm:$0xff] }
  0x28   :  { %v498_v31 = vld [vmem:[%s1971_s4 + $0xc0] sm:$0xff] }
  0x29   :  { %593 = vperm.xlu0 %1419, %v491_v34  }
  0x2a   :  { %513 = vperm.xlu1 %1420, %v475_v40  }
  0x2c   :  { %1377 = vmatmul.mubr.msk.bf16.gmra.mrb[8].mxu0 %vm152_vm0, %v1426_v18 }
  0x2d   :  { %1380 = vmatprep.mubr.msk.bf16.mxu0 %vm152_vm0, %v1427_v19  ;;  %598 = vperm.xlu0 %1419, %v492_v41  }
  0x2e   :  { %603 = vperm.xlu1 %1420, %v493_v45  }
  0x31   :  { %518 = vperm.xlu0 %1419, %v476_v48   ;;  %v483_v48 = vld [vmem:[%s1971_s4 + $0x48] sm:$0xff] }
  0x32   :  { %523 = vperm.xlu1 %1420, %v477_v58   ;;  %v484_v58 = vld [vmem:[%s1971_s4 + $0x50] sm:$0xff] }
  0x34   :  { %1381 = vmatmul.mubr.msk.bf16.gmra.mrb[12].mxu0 %vm152_vm0, %v1428_v20  ;;  %v480_v20 = vld [vmem:[%s1971_s4 + $0x30] sm:$0xff] }
  0x35   :  { %1384 = vmatprep.mubr.msk.bf16.mxu0 %vm152_vm0, %v1429_v21  ;;  %608 = vperm.xlu0 %1419, %v494_v59  }
  0x36   :  { %613 = vperm.xlu1 %1420, %v495_v63  }
  0x39   :  { %528 = vperm.xlu0 %1419, %v478_v2  }
  0x3a   :  { %533 = vperm.xlu1 %1420, %v479_v12  }
  0x3c   :  { %1385 = vmatmul.mubr.msk.bf16.gmra.mrb[16].mxu0 %vm152_vm0, %v1430_v22 }
  0x3d   :  { %1388 = vmatprep.mubr.msk.bf16.mxu0 %vm152_vm0, %v1431_v23  ;;  %618 = vperm.xlu0 %1419, %v496_v13  }
  0x3e   :  { %623 = vperm.xlu1 %1420, %v497_v17  }
  0x41   :  { %538 = vperm.xlu0 %1419, %v480_v20  }
  0x44   :  { %1389 = vmatmul.mubr.msk.bf16.gmra.mrb[20].mxu0 %vm152_vm0, %v1432_v24 }
  0x45   :  { %1392 = vmatprep.mubr.msk.bf16.mxu0 %vm152_vm0, %v1433_v25  ;;  %628 = vperm.xlu0 %1419, %v498_v31  }
  0x4c   :  { %1393 = vmatmul.mubr.msk.bf16.gmra.mrb[24].mxu0 %vm152_vm0, %v1434_v26 }
  0x4d   :  { %1396 = vmatprep.mubr.msk.bf16.mxu0 %vm152_vm0, %v1435_v27 }
  0x54   :  { %1397 = vmatmul.mubr.msk.bf16.gmra.mrb[28].mxu0 %vm152_vm0, %v1436_v28 }
  0x55   :  { %858 = vmatprep.mubr.bf16.mxu0 %v1442_v30  ;;  %v481_v30 = vld [vmem:[%s1971_s4 + $0x38] sm:$0xff] }
  0x56   :  { %543 = vperm.xlu1 %1420, %v481_v30  }
  0xef   :  { %v1370_v35 = vpop.f32.mrb[0].mxu0 }
  0xf0   :  { %v364_v36 = vmul.f32 0.2, %v1370_v35  ;;  %v235_v37 = vpop.f32.mrb[1].mxu0 }
  0xf1   :  { %v362_v38 = vmul.f32 0.2, %v235_v37  ;;  %v1371_v39 = vpop.f32.mrb[2].mxu0 }
  0xf2   :  { %v365_v42 = vmul.f32 0.2, %v1371_v39  ;;  %v238_v43 = vpop.f32.mrb[3].mxu0  ;;  %v396_v46 = vmax.f32 %v1370_v35, %v364_v36  ;;  %v499_v35 = vld [vmem:[%s1971_s4 + $0xc8] sm:$0xff] }
  0xf3   :  { %v363_v44 = vmul.f32 0.2, %v238_v43  ;;  %v394_v49 = vmax.f32 %v235_v37, %v362_v38  ;;  %v482_v38 = vld [vmem:[%s1971_s4 + $0x40] sm:$0xff]  ;;  %633 = vperm.xlu1 %1420, %v499_v35  }
  0xf4   :  { %v397_v47 = vmax.f32 %v1371_v39, %v365_v42  ;;  %548 = vperm.xlu0 %1419, %v482_v38  }
  0xf5   :  { %v395_v50 = vmax.f32 %v238_v43, %v363_v44 }
  0xf6   :  { %v1659_v51 = vpack.c.bf16 %v397_v47, %v396_v46 }
  0xf7   :  { %v1661_v52 = vpack.c.bf16 %v395_v50, %v394_v49  ;;  %v1374_v53 = vpop.f32.mrb[4].mxu0  ;;  %v500_v49 = vld [vmem:[%s1971_s4 + $0xd0] sm:$0xff]  ;;  %553 = vperm.xlu1 %1420, %v483_v48  }
  0xf8   :  { %v368_v54 = vmul.f32 0.2, %v1374_v53  ;;  %v251_v55 = vpop.f32.mrb[5].mxu0  ;;  %638 = vperm.xlu0 %1419, %v500_v49  }
  0xf9   :  { %v366_v56 = vmul.f32 0.2, %v251_v55  ;;  %v1375_v57 = vpop.f32.mrb[6].mxu0 }
  0xfa   :  { %v369_v60 = vmul.f32 0.2, %v1375_v57  ;;  %v254_v61 = vpop.f32.mrb[7].mxu0  ;;  %v400_v0 = vmax.f32 %v1374_v53, %v368_v54 }
  0xfb   :  { %v367_v62 = vmul.f32 0.2, %v254_v61  ;;  %v398_v3 = vmax.f32 %v251_v55, %v366_v56  ;;  %v501_v55 = vld [vmem:[%s1971_s4 + $0xd8] sm:$0xff] }
  0xfc   :  { %v401_v1 = vmax.f32 %v1375_v57, %v369_v60  ;;  %643 = vperm.xlu1 %1420, %v501_v55   ;;  %558 = vperm.xlu0 %1419, %v484_v58   ;;  %v1440_v55 = vld [vmem:[%s1970_s3] ss:$8 sps:$4 sm:$0xff]   ;;  %v1452_v58 = vld [vmem:[%s1970_s3 + $0x24] ss:$8 sps:$4 sm:$0xff]  }
  0xfd   :  { %v399_v4 = vmax.f32 %v254_v61, %v367_v62 }
  0xfe   :  { %v1675_v5 = vpack.c.bf16 %v401_v1, %v400_v0 }
  0xff   :  { %v1677_v6 = vpack.c.bf16 %v399_v4, %v398_v3  ;;  %v1378_v7 = vpop.f32.mrb[8].mxu0  ;;  %v485_v4 = vld [vmem:[%s1971_s4 + $0x58] sm:$0xff] }
 0x100   :  { %v372_v8 = vmul.f32 0.2, %v1378_v7  ;;  %v267_v9 = vpop.f32.mrb[9].mxu0  ;;  %563 = vperm.xlu1 %1420, %v485_v4   ;;  %v1466_v4 = vld [vmem:[%s1970_s3 + $0x90] ss:$8 sps:$4 sm:$0xff]  }
 0x101   :  { %v370_v10 = vmul.f32 0.2, %v267_v9  ;;  %v1379_v11 = vpop.f32.mrb[10].mxu0 }
 0x102   :  { %v373_v14 = vmul.f32 0.2, %v1379_v11  ;;  %v270_v15 = vpop.f32.mrb[11].mxu0  ;;  %v404_v18 = vmax.f32 %v1378_v7, %v372_v8  ;;  %v502_v7 = vld [vmem:[%s1971_s4 + $0xe0] sm:$0xff] }
 0x103   :  { %v371_v16 = vmul.f32 0.2, %v270_v15  ;;  %v402_v21 = vmax.f32 %v267_v9, %v370_v10  ;;  %648 = vperm.xlu0 %1419, %v502_v7   ;;  %v1467_v7 = vld [vmem:[%s1970_s3 + $0xa4] ss:$8 sps:$4 sm:$0xff]  }
 0x104   :  { %v405_v19 = vmax.f32 %v1379_v11, %v373_v14 }
 0x105   :  { %v403_v22 = vmax.f32 %v270_v15, %v371_v16  ;;  %v503_v15 = vld [vmem:[%s1971_s4 + $0xe8] sm:$0xff]  ;;  %v486_v16 = vld [vmem:[%s1971_s4 + $0x60] sm:$0xff] }
 0x106   :  { %v1691_v23 = vpack.c.bf16 %v405_v19, %v404_v18  ;;  %653 = vperm.xlu1 %1420, %v503_v15   ;;  %v1479_v15 = vld [vmem:[%s1970_s3 + $0xe4] ss:$8 sps:$4 sm:$0xff]  }
 0x107   :  { %v1693_v24 = vpack.c.bf16 %v403_v22, %v402_v21  ;;  %v1382_v25 = vpop.f32.mrb[12].mxu0  ;;  %568 = vperm.xlu0 %1419, %v486_v16   ;;  %v1481_v16 = vld [vmem:[%s1970_s3 + $0xe0] ss:$8 sps:$4 sm:$0xff]  }
 0x108   :  { %v376_v26 = vmul.f32 0.2, %v1382_v25  ;;  %v283_v27 = vpop.f32.mrb[13].mxu0 }
 0x109   :  { %v374_v28 = vmul.f32 0.2, %v283_v27  ;;  %v1383_v29 = vpop.f32.mrb[14].mxu0 }
 0x10a   :  { %v377_v32 = vmul.f32 0.2, %v1383_v29  ;;  %v286_v33 = vpop.f32.mrb[15].mxu0  ;;  %v408_v36 = vmax.f32 %v1382_v25, %v376_v26  ;;  %v487_v25 = vld [vmem:[%s1971_s4 + $0x68] sm:$0xff]  ;;  %v504_v26 = vld [vmem:[%s1971_s4 + $0xf0] sm:$0xff] }
 0x10b   :  { %v375_v34 = vmul.f32 0.2, %v286_v33  ;;  %v406_v39 = vmax.f32 %v283_v27, %v374_v28  ;;  %573 = vperm.xlu1 %1420, %v487_v25   ;;  %658 = vperm.xlu0 %1419, %v504_v26  }
 0x10c   :  { %v409_v37 = vmax.f32 %v1383_v29, %v377_v32 }
 0x10d   :  { %v407_v40 = vmax.f32 %v286_v33, %v375_v34  ;;  %v505_v33 = vld [vmem:[%s1971_s4 + $0xf8] sm:$0xff]  ;;  %v488_v34 = vld [vmem:[%s1971_s4 + $0x70] sm:$0xff] }
 0x10e   :  { %v1707_v41 = vpack.c.bf16 %v409_v37, %v408_v36 }
 0x10f   :  { %v1709_v42 = vpack.c.bf16 %v407_v40, %v406_v39  ;;  %v1386_v43 = vpop.f32.mrb[16].mxu0  ;;  %663 = vperm.xlu1 %1420, %v505_v33   ;;  %578 = vperm.xlu0 %1419, %v488_v34  }
 0x110   :  { %v380_v44 = vmul.f32 0.2, %v1386_v43  ;;  %v299_v45 = vpop.f32.mrb[17].mxu0 }
 0x111   :  { %v378_v46 = vmul.f32 0.2, %v299_v45  ;;  %v1387_v47 = vpop.f32.mrb[18].mxu0 }
 0x112   :  { %v381_v50 = vmul.f32 0.2, %v1387_v47  ;;  %v302_v53 = vpop.f32.mrb[19].mxu0  ;;  %v412_v56 = vmax.f32 %v1386_v43, %v380_v44  ;;  %v489_v43 = vld [vmem:[%s1971_s4 + $0x78] sm:$0xff]  ;;  %v1068_v44 = vld [vmem:[%s1973_s6] sm:$0xff] }
 0x113   :  { %v379_v54 = vmul.f32 0.2, %v302_v53  ;;  %v410_v59 = vmax.f32 %v299_v45, %v378_v46  ;;  %583 = vperm.xlu1 %1420, %v489_v43   ;;  %1071 = vperm.xlu0 %1419, %v1068_v44  }
 0x114   :  { %v413_v57 = vmax.f32 %v1387_v47, %v381_v50 }
 0x115   :  { %v411_v60 = vmax.f32 %v302_v53, %v379_v54 }
 0x116   :  { %v435_v61 = vpack.c.bf16 %v413_v57, %v412_v56  ;;  %v1445_v56 = vld [vmem:[%s1970_s3 + $0x50] ss:$8 sps:$4 sm:$0xff]   ;;  %v1449_v57 = vld [vmem:[%s1970_s3 + $0x64] ss:$8 sps:$4 sm:$0xff]  }
 0x117   :  { %v434_v62 = vpack.c.bf16 %v411_v60, %v410_v59  ;;  %v1390_v63 = vpop.f32.mrb[20].mxu0  ;;  %v1451_v59 = vld [vmem:[%s1970_s3 + $0x60] ss:$8 sps:$4 sm:$0xff]  }
 0x118   :  { %v384_v0 = vmul.f32 0.2, %v1390_v63  ;;  %v315_v1 = vpop.f32.mrb[21].mxu0  ;;  %v1454_v60 = vld [vmem:[%s1970_s3 + $0x20] ss:$8 sps:$4 sm:$0xff]  }
 0x119   :  { %v382_v2 = vmul.f32 0.2, %v315_v1  ;;  %v1391_v3 = vpop.f32.mrb[22].mxu0  ;;  %1228 = vmatprep.subr.bf16.mxu0 %v434_v62  ;;  %1400 = vmatprep.subr.bf16.mxu1 %v434_v62  ;;  %v1458_v62 = vld [vmem:[%s1970_s3 + $0x34] ss:$8 sps:$4 sm:$0xff]  }
 0x11a   :  { %v385_v8 = vmul.f32 0.2, %v1391_v3  ;;  %v318_v9 = vpop.f32.mrb[23].mxu0  ;;  %1229 = vmatpush3.bf16.msra.mxu0 %v1661_v52  ;;  %1408 = vmatpush3.bf16.msra.mxu1 %v1661_v52  ;;  %v416_v11 = vmax.f32 %v1390_v63, %v384_v0  ;;  %v1457_v63 = vld [vmem:[%s1970_s3 + $0x70] ss:$8 sps:$4 sm:$0xff]  }
 0x11b   :  { %v383_v10 = vmul.f32 0.2, %v318_v9  ;;  %1230 = vmatprep.subr.bf16.mxu0 %v435_v61  ;;  %1401 = vmatprep.subr.bf16.mxu1 %v435_v61  ;;  %v414_v13 = vmax.f32 %v315_v1, %v382_v2  ;;  %v1455_v61 = vld [vmem:[%s1970_s3 + $0x74] ss:$8 sps:$4 sm:$0xff]   ;;  %v1460_v0 = vld [vmem:[%s1970_s3 + $0x30] ss:$8 sps:$4 sm:$0xff]  }
 0x11c   :  { %v417_v12 = vmax.f32 %v1391_v3, %v385_v8  ;;  %v1461_v1 = vld [vmem:[%s1970_s3 + $0x84] ss:$8 sps:$4 sm:$0xff]   ;;  %v1463_v2 = vld [vmem:[%s1970_s3 + $0x80] ss:$8 sps:$4 sm:$0xff]   ;;  %v1464_v3 = vld [vmem:[%s1970_s3 + $0x94] ss:$8 sps:$4 sm:$0xff]  }
 0x11d   :  { %v415_v14 = vmax.f32 %v318_v9, %v383_v10  ;;  %v1469_v8 = vld [vmem:[%s1970_s3 + $0xa0] ss:$8 sps:$4 sm:$0xff]   ;;  %v1470_v9 = vld [vmem:[%s1970_s3 + $0xb4] ss:$8 sps:$4 sm:$0xff]   ;;  %v1472_v10 = vld [vmem:[%s1970_s3 + $0xb0] ss:$8 sps:$4 sm:$0xff]  }
 0x11e   :  { %v437_v17 = vpack.c.bf16 %v417_v12, %v416_v11  ;;  %1231 = vmatpush3.bf16.msra.mxu0 %v1659_v51  ;;  %1409 = vmatpush3.bf16.msra.mxu1 %v1659_v51  ;;  %v1473_v11 = vld [vmem:[%s1970_s3 + $0xc4] ss:$8 sps:$4 sm:$0xff]   ;;  %v1475_v12 = vld [vmem:[%s1970_s3 + $0xc0] ss:$8 sps:$4 sm:$0xff]  }
 0x11f   :  { %v436_v52 = vpack.c.bf16 %v415_v14, %v414_v13  ;;  %v1394_v18 = vpop.f32.mrb[24].mxu0  ;;  %v1476_v13 = vld [vmem:[%s1970_s3 + $0xd4] ss:$8 sps:$4 sm:$0xff]   ;;  %v1478_v14 = vld [vmem:[%s1970_s3 + $0xd0] ss:$8 sps:$4 sm:$0xff]  }
 0x120   :  { %v388_v19 = vmul.f32 0.2, %v1394_v18  ;;  %v331_v20 = vpop.f32.mrb[25].mxu0 }
 0x121   :  { %v386_v21 = vmul.f32 0.2, %v331_v20  ;;  %v1395_v22 = vpop.f32.mrb[26].mxu0  ;;  %1232 = vmatprep.subr.bf16.mxu0 %v436_v52  ;;  %1402 = vmatprep.subr.bf16.mxu1 %v436_v52  ;;  %v1484_v52 = vld [vmem:[%s1970_s3 + $0xf0] ss:$8 sps:$4 sm:$0xff]  }
 0x122   :  { %v389_v27 = vmul.f32 0.2, %v1395_v22  ;;  %v334_v51 = vpop.f32.mrb[27].mxu0  ;;  %1233 = vmatpush3.bf16.msra.mxu0 %v1677_v6  ;;  %1410 = vmatpush3.bf16.msra.mxu1 %v1677_v6  ;;  %v420_v29 = vmax.f32 %v1394_v18, %v388_v19  ;;  %v1859_v18 = vpop.permute.xlu0 %588 }
 0x123   :  { %v387_v28 = vmul.f32 0.2, %v334_v51  ;;  %1234 = vmatprep.subr.bf16.mxu0 %v437_v17  ;;  %1403 = vmatprep.subr.bf16.mxu1 %v437_v17  ;;  %v418_v31 = vmax.f32 %v331_v20, %v386_v21  ;;  %v1482_v17 = vld [vmem:[%s1970_s3 + $0xf4] ss:$8 sps:$4 sm:$0xff]   ;;  %v509_v19 = vpop.permute.xlu1 %508 }
 0x124   :  { %v421_v30 = vmax.f32 %v1395_v22, %v389_v27 }
 0x125   :  { %v419_v32 = vmax.f32 %v334_v51, %v387_v28 }
 0x126   :  { %v439_v35 = vpack.c.bf16 %v421_v30, %v420_v29  ;;  %1235 = vmatpush3.bf16.msra.mxu0 %v1675_v5  ;;  %1411 = vmatpush3.bf16.msra.mxu1 %v1675_v5  ;;  %v1861_v20 = vpop.permute.xlu0 %593 }
 0x127   :  { %v438_v6 = vpack.c.bf16 %v419_v32, %v418_v31  ;;  %v1398_v36 = vpop.f32.mrb[28].mxu0  ;;  %v514_v21 = vpop.permute.xlu1 %513 }
 0x128   :  { %v392_v37 = vmul.f32 0.2, %v1398_v36  ;;  %v347_v38 = vpop.f32.mrb[29].mxu0 }
 0x129   :  { %v390_v39 = vmul.f32 0.2, %v347_v38  ;;  %v1399_v40 = vpop.f32.mrb[30].mxu0  ;;  %1236 = vmatprep.subr.bf16.mxu0 %v438_v6  ;;  %1404 = vmatprep.subr.bf16.mxu1 %v438_v6 }
 0x12a   :  { %v393_v45 = vmul.f32 0.2, %v1399_v40  ;;  %v350_v5 = vpop.f32.mrb[31].mxu0  ;;  %1237 = vmatpush3.bf16.msra.mxu0 %v1693_v24  ;;  %1412 = vmatpush3.bf16.msra.mxu1 %v1693_v24  ;;  %v424_v47 = vmax.f32 %v1398_v36, %v392_v37  ;;  %v1437_v24 = vld [vmem:[%s1970_s3 + $0x40] ss:$8 sps:$4 sm:$0xff]   ;;  %v1863_v22 = vpop.permute.xlu0 %598 }
 0x12b   :  { %v391_v46 = vmul.f32 0.2, %v350_v5  ;;  %1238 = vmatprep.subr.bf16.mxu0 %v439_v35  ;;  %1405 = vmatprep.subr.bf16.mxu1 %v439_v35  ;;  %v422_v49 = vmax.f32 %v347_v38, %v390_v39  ;;  %v1865_v25 = vpop.permute.xlu1 %603  ;;  %v1890_v35 = vld [vmem:[%s1972_s5] sm:$0xff]  ;;  %s1521_s5 = smov [#allocation2]  }
 0x12c   :  { %v425_v48 = vmax.f32 %v1399_v40, %v393_v45  ;;  %v1207_v37 = vcombine.high %v1890_v35, %v1890_v35  ;;  %s1134_s0 = sshll.u32 %s1521_s5, 4  ;;  %s1135_s0 = int_to_ptr.vmem [resolvable:$true] %s1134_s0 }
 0x12d   :  { %v423_v50 = vmax.f32 %v350_v5, %v391_v46  ;;  %s1495_s1 = scalar_lea.vmem %s1135_s0, 128  ;;  %p1500_p1 = scmp.lt.s32.totalorder %s1135_s0, %s1135_s0 }
 0x12e   :  { %v441_v53 = vpack.c.bf16 %v425_v48, %v424_v47  ;;  %1239 = vmatpush3.bf16.msra.mxu0 %v1691_v23  ;;  %1413 = vmatpush3.bf16.msra.mxu1 %v1691_v23  ;;  %v1443_v23 = vld [vmem:[%s1970_s3 + $0x54] ss:$8 sps:$4 sm:$0xff]   ;;  %v1867_v26 = vpop.permute.xlu0 %518  ;;  %p1496_p0 = scmp.ne.s32.totalorder %s1135_s0, %s1495_s1  ;;  %p1501_p2 = scmp.lt.s32.totalorder %s1495_s1, %s1495_s1 }
 0x12f   :  { %v440_v54 = vpack.c.bf16 %v423_v50, %v422_v49  ;;  %v1869_v27 = vpop.permute.xlu1 %523 }
 0x130   :  { %p1502_p3 = por %p1501_p2, %p1500_p1 }
 0x131   :  { %1240 = vmatprep.subr.bf16.mxu0 %v440_v54  ;;  %1406 = vmatprep.subr.bf16.mxu1 %v440_v54 }
 0x132   :  { %1241 = vmatpush3.bf16.msra.mxu0 %v1709_v42  ;;  %1414 = vmatpush3.bf16.msra.mxu1 %v1709_v42  ;;  %v1446_v42 = vld [vmem:[%s1970_s3 + $0x14] ss:$8 sps:$4 sm:$0xff]   ;;  %v1871_v51 = vpop.permute.xlu0 %608  ;;  %p1503_p4 = pnand %p1502_p3, %p1496_p0 }
 0x133   :  { %1242 = vmatprep.subr.bf16.mxu0 %v441_v53  ;;  %1407 = vmatprep.subr.bf16.mxu1 %v441_v53  ;;  %v1873_v28 = vpop.permute.xlu1 %613 }
 0x136   :  { %1243 = vmatpush3.bf16.msra.mxu0 %v1707_v41  ;;  %1415 = vmatpush3.bf16.msra.mxu1 %v1707_v41  ;;  %v1448_v41 = vld [vmem:[%s1970_s3 + $0x10] ss:$8 sps:$4 sm:$0xff]   ;;  %v1875_v29 = vpop.permute.xlu0 %528 }
 0x137   :  { %v1877_v30 = vpop.permute.xlu1 %533 }
 0x139   :  { %891 = vmatmul.mubr.bf16.vlgmr.msra.gmra.mrb[0].mxu1 %v1437_v24  ;;  %859 = vmatmul.mubr.bf16.vlgmr.msra.gmra.mrb[32].mxu0 %v1440_v55 }
 0x13a   :  { %898 = vmatprep.mubr.bf16.mxu1 %v1443_v23  ;;  %866 = vmatprep.mubr.bf16.mxu0 %v1446_v42  ;;  %v1879_v31 = vpop.permute.xlu0 %618 }
 0x13b   :  { %v1881_v32 = vpop.permute.xlu1 %623 }
 0x13e   :  { %v1883_v33 = vpop.permute.xlu0 %538 }
 0x13f   :  { %v1885_v34 = vpop.permute.xlu1 %543 }
 0x141   :  { %899 = vmatmul.mubr.bf16.gmra.mrb[4].mxu1 %v1445_v56  ;;  %867 = vmatmul.mubr.bf16.gmra.mrb[36].mxu0 %v1448_v41 }
 0x142   :  { %906 = vmatprep.mubr.bf16.mxu1 %v1449_v57  ;;  %874 = vmatprep.mubr.bf16.mxu0 %v1452_v58  ;;  %v1892_v6 = vpop.permute.xlu0 %628 }
 0x149   :  { %907 = vmatmul.mubr.bf16.gmra.mrb[8].mxu1 %v1451_v59  ;;  %875 = vmatmul.mubr.bf16.gmra.mrb[40].mxu0 %v1454_v60 }
 0x14a   :  { %914 = vmatprep.mubr.bf16.mxu1 %v1455_v61  ;;  %882 = vmatprep.mubr.bf16.mxu0 %v1458_v62 }
 0x151   :  { %915 = vmatmul.mubr.bf16.gmra.mrb[12].mxu1 %v1457_v63  ;;  %883 = vmatmul.mubr.bf16.gmra.mrb[44].mxu0 %v1460_v0 }
 0x152   :  { %922 = vmatprep.mubr.bf16.mxu1 %v1461_v1  ;;  %1113 = vmatprep.mubr.bf16.mxu0 %v1207_v37 }
 0x159   :  { %923 = vmatmul.mubr.bf16.gmra.mrb[16].mxu1 %v1463_v2 }
 0x15a   :  { %930 = vmatprep.mubr.bf16.mxu1 %v1464_v3 }
 0x161   :  { %931 = vmatmul.mubr.bf16.gmra.mrb[20].mxu1 %v1466_v4 }
 0x162   :  { %938 = vmatprep.mubr.bf16.mxu1 %v1467_v7 }
 0x169   :  { %939 = vmatmul.mubr.bf16.gmra.mrb[24].mxu1 %v1469_v8 }
 0x16a   :  { %946 = vmatprep.mubr.bf16.mxu1 %v1470_v9 }
 0x171   :  { %947 = vmatmul.mubr.bf16.gmra.mrb[28].mxu1 %v1472_v10 }
 0x172   :  { %954 = vmatprep.mubr.bf16.mxu1 %v1473_v11  ;;  %v1894_v36 = vpop.permute.xlu1 %633 }
 0x173   :  { %v549_v38 = vpop.permute.xlu0 %548 }
 0x176   :  { %v554_v39 = vpop.permute.xlu1 %553 }
 0x177   :  { %v1898_v40 = vpop.permute.xlu0 %638 }
 0x179   :  { %955 = vmatmul.mubr.bf16.gmra.mrb[32].mxu1 %v1475_v12 }
 0x17a   :  { %962 = vmatprep.mubr.bf16.mxu1 %v1476_v13 }
 0x17b   :  { %v1900_v43 = vpop.permute.xlu1 %643  ;;  %v559_v44 = vpop.permute.xlu0 %558 }
 0x17f   :  { %v564_v45 = vpop.permute.xlu1 %563 }
 0x181   :  { %963 = vmatmul.mubr.bf16.gmra.mrb[36].mxu1 %v1478_v14 }
 0x182   :  { %970 = vmatprep.mubr.bf16.mxu1 %v1479_v15  ;;  %v1902_v5 = vpop.permute.xlu0 %648 }
 0x185   :  { %v1904_v46 = vpop.permute.xlu1 %653 }
 0x186   :  { %v569_v63 = vpop.permute.xlu0 %568 }
 0x189   :  { %971 = vmatmul.mubr.bf16.gmra.mrb[40].mxu1 %v1481_v16 }
 0x18a   :  { %978 = vmatprep.mubr.bf16.mxu1 %v1482_v17  ;;  %v574_v0 = vpop.permute.xlu1 %573 }
 0x191   :  { %979 = vmatmul.mubr.bf16.gmra.mrb[44].mxu1 %v1484_v52 }
 0x20c   :  { %v1268_v47 = vpop.f32.mrb[0].mxu1  ;;  %v1244_v48 = vpop.f32.mrb[32].mxu0 }
 0x20d   :  { %v1269_v49 = vpop.f32.mrb[1].mxu1  ;;  %v1245_v50 = vpop.f32.mrb[33].mxu0 }
 0x20e   :  { %v1270_v53 = vadd.f32 %v1269_v49, %v1268_v47  ;;  %v1271_v54 = vpop.f32.mrb[2].mxu1  ;;  %v1246_v24 = vadd.f32 %v1245_v50, %v1244_v48  ;;  %v1247_v55 = vpop.f32.mrb[34].mxu0 }
 0x20f   :  { %v1272_v23 = vpop.f32.mrb[3].mxu1  ;;  %v1248_v42 = vpop.f32.mrb[35].mxu0 }
 0x210   :  { %v893_v56 = vadd.f32 %v1270_v53, %v549_v38  ;;  %v1273_v41 = vadd.f32 %v1272_v23, %v1271_v54  ;;  %v861_v57 = vadd.f32 %v1246_v24, %v509_v19  ;;  %v1249_v58 = vadd.f32 %v1248_v42, %v1247_v55  ;;  %v1912_v54 = vpop.permute.xlu0 %658  ;;  %v1914_v24 = vpop.permute.xlu1 %663 }
 0x212   :  { %v995_v59 = vmul.f32 0.2, %v893_v56  ;;  %v896_v60 = vadd.f32 %v1273_v41, %v554_v39  ;;  %v987_v61 = vmul.f32 0.2, %v861_v57  ;;  %v864_v62 = vadd.f32 %v1249_v58, %v514_v21 }
 0x214   :  { %v996_v1 = vmul.f32 0.2, %v896_v60  ;;  %v1274_v2 = vpop.f32.mrb[4].mxu1  ;;  %v1019_v3 = vmax.f32 %v861_v57, %v987_v61  ;;  %v988_v4 = vmul.f32 0.2, %v864_v62  ;;  %v1250_v7 = vpop.f32.mrb[36].mxu0  ;;  %v1027_v8 = vmax.f32 %v893_v56, %v995_v59 }
 0x215   :  { %v1275_v9 = vpop.f32.mrb[5].mxu1  ;;  %v1251_v10 = vpop.f32.mrb[37].mxu0 }
 0x216   :  { %v1028_v11 = vmax.f32 %v896_v60, %v996_v1  ;;  %v1276_v12 = vadd.f32 %v1275_v9, %v1274_v2  ;;  %v1277_v13 = vpop.f32.mrb[6].mxu1  ;;  %v1020_v14 = vmax.f32 %v864_v62, %v988_v4  ;;  %v1252_v15 = vadd.f32 %v1251_v10, %v1250_v7  ;;  %v1253_v16 = vpop.f32.mrb[38].mxu0 }
 0x217   :  { %v1278_v17 = vpop.f32.mrb[7].mxu1  ;;  %v1254_v52 = vpop.f32.mrb[39].mxu0 }
 0x218   :  { %v1906_v19 = vpack.c.bf16 %v1028_v11, %v1027_v8  ;;  %v901_v21 = vadd.f32 %v1276_v12, %v559_v44  ;;  %v1279_v37 = vadd.f32 %v1278_v17, %v1277_v13  ;;  %v1908_v38 = vpack.c.bf16 %v1020_v14, %v1019_v3  ;;  %v579_v14 = vpop.permute.xlu0 %578 }
 0x219   :  { %v869_v39 = vadd.f32 %v1252_v15, %v1867_v26  ;;  %v1255_v47 = vadd.f32 %v1254_v52, %v1253_v16  ;;  %v584_v15 = vpop.permute.xlu1 %583 }
 0x21a   :  { %v997_v48 = vmul.f32 0.2, %v901_v21  ;;  %v904_v49 = vadd.f32 %v1279_v37, %v564_v45 }
 0x21b   :  { %v989_v50 = vmul.f32 0.2, %v869_v39  ;;  %v872_v53 = vadd.f32 %v1255_v47, %v1869_v27 }
 0x21c   :  { %v998_v55 = vmul.f32 0.2, %v904_v49  ;;  %v1280_v23 = vpop.f32.mrb[8].mxu1  ;;  %v1256_v42 = vpop.f32.mrb[40].mxu0  ;;  %v1029_v58 = vmax.f32 %v901_v21, %v997_v48 }
 0x21d   :  { %v1281_v56 = vpop.f32.mrb[9].mxu1  ;;  %v1021_v44 = vmax.f32 %v869_v39, %v989_v50  ;;  %v990_v41 = vmul.f32 0.2, %v872_v53  ;;  %v1257_v57 = vpop.f32.mrb[41].mxu0 }
 0x21e   :  { %v1030_v59 = vmax.f32 %v904_v49, %v998_v55  ;;  %v1282_v26 = vadd.f32 %v1281_v56, %v1280_v23  ;;  %v1283_v60 = vpop.f32.mrb[10].mxu1  ;;  %v1258_v61 = vadd.f32 %v1257_v57, %v1256_v42  ;;  %v1259_v45 = vpop.f32.mrb[42].mxu0 }
 0x21f   :  { %v1284_v62 = vpop.f32.mrb[11].mxu1  ;;  %v1022_v1 = vmax.f32 %v872_v53, %v990_v41  ;;  %v1260_v27 = vpop.f32.mrb[43].mxu0 }
 0x220   :  { %v1916_v2 = vpack.c.bf16 %v1030_v59, %v1029_v58  ;;  %v909_v3 = vadd.f32 %v1282_v26, %v569_v63  ;;  %v1285_v4 = vadd.f32 %v1284_v62, %v1283_v60  ;;  %v877_v7 = vadd.f32 %v1258_v61, %v1875_v29 }
 0x221   :  { %v1919_v8 = vpack.c.bf16 %v1022_v1, %v1021_v44  ;;  %v1261_v9 = vadd.f32 %v1260_v27, %v1259_v45 }
 0x222   :  { %v999_v10 = vmul.f32 0.2, %v909_v3  ;;  %v912_v11 = vadd.f32 %v1285_v4, %v574_v0  ;;  %v991_v12 = vmul.f32 0.2, %v877_v7 }
 0x223   :  { %v880_v13 = vadd.f32 %v1261_v9, %v1877_v30 }
 0x224   :  { %v1000_v16 = vmul.f32 0.2, %v912_v11  ;;  %v1286_v17 = vpop.f32.mrb[12].mxu1  ;;  %v1262_v52 = vpop.f32.mrb[44].mxu0  ;;  %v1023_v21 = vmax.f32 %v877_v7, %v991_v12  ;;  %v1031_v47 = vmax.f32 %v909_v3, %v999_v10 }
 0x225   :  { %v1287_v37 = vpop.f32.mrb[13].mxu1  ;;  %v992_v39 = vmul.f32 0.2, %v880_v13  ;;  %v1263_v63 = vpop.f32.mrb[45].mxu0 }
 0x226   :  { %v1032_v48 = vmax.f32 %v912_v11, %v1000_v16  ;;  %v1288_v29 = vadd.f32 %v1287_v37, %v1286_v17  ;;  %v1289_v49 = vpop.f32.mrb[14].mxu1  ;;  %v1264_v50 = vadd.f32 %v1263_v63, %v1262_v52  ;;  %v1265_v53 = vpop.f32.mrb[46].mxu0 }
 0x227   :  { %v1024_v55 = vmax.f32 %v880_v13, %v992_v39  ;;  %v1290_v0 = vpop.f32.mrb[15].mxu1  ;;  %v1266_v23 = vpop.f32.mrb[47].mxu0 }
 0x228   :  { %v1922_v42 = vpack.c.bf16 %v1032_v48, %v1031_v47  ;;  %v917_v30 = vadd.f32 %v1288_v29, %v579_v14  ;;  %v1291_v56 = vadd.f32 %v1290_v0, %v1289_v49  ;;  %v885_v44 = vadd.f32 %v1264_v50, %v1883_v33 }
 0x229   :  { %v1925_v41 = vpack.c.bf16 %v1024_v55, %v1023_v21  ;;  %v1267_v57 = vadd.f32 %v1266_v23, %v1265_v53 }
 0x22a   :  { %v1001_v58 = vmul.f32 0.2, %v917_v30  ;;  %v993_v59 = vmul.f32 0.2, %v885_v44  ;;  %v920_v26 = vadd.f32 %v1291_v56, %v584_v15 }
 0x22b   :  { %v888_v60 = vadd.f32 %v1267_v57, %v1885_v34 }
 0x22c   :  { %v1002_v61 = vmul.f32 0.2, %v920_v26  ;;  %v1292_v45 = vpop.f32.mrb[16].mxu1  ;;  %v1025_v62 = vmax.f32 %v885_v44, %v993_v59  ;;  %v1033_v3 = vmax.f32 %v917_v30, %v1001_v58 }
 0x22d   :  { %v994_v1 = vmul.f32 0.2, %v888_v60  ;;  %v1293_v27 = vpop.f32.mrb[17].mxu1 }
 0x22e   :  { %v1034_v4 = vmax.f32 %v920_v26, %v1002_v61  ;;  %v1294_v7 = vadd.f32 %v1293_v27, %v1292_v45  ;;  %v1295_v9 = vpop.f32.mrb[18].mxu1 }
 0x22f   :  { %v1026_v10 = vmax.f32 %v888_v60, %v994_v1  ;;  %v1296_v11 = vpop.f32.mrb[19].mxu1 }
 0x230   :  { %v1928_v33 = vpack.c.bf16 %v1034_v4, %v1033_v3  ;;  %v925_v12 = vadd.f32 %v1294_v7, %v1859_v18  ;;  %v1297_v13 = vadd.f32 %v1296_v11, %v1295_v9 }
 0x231   :  { %v1054_v14 = vpack.c.bf16 %v1026_v10, %v1025_v62 }
 0x232   :  { %v1003_v15 = vmul.f32 0.2, %v925_v12  ;;  %v928_v34 = vadd.f32 %v1297_v13, %v1861_v20 }
 0x234   :  { %v1004_v16 = vmul.f32 0.2, %v928_v34  ;;  %v1298_v17 = vpop.f32.mrb[20].mxu1  ;;  %v1035_v21 = vmax.f32 %v925_v12, %v1003_v15 }
 0x235   :  { %v1299_v52 = vpop.f32.mrb[21].mxu1 }
 0x236   :  { %v1036_v37 = vmax.f32 %v928_v34, %v1004_v16  ;;  %v1300_v39 = vadd.f32 %v1299_v52, %v1298_v17  ;;  %v1301_v63 = vpop.f32.mrb[22].mxu1 }
 0x237   :  { %v1302_v47 = vpop.f32.mrb[23].mxu1 }
 0x238   :  { %v933_v48 = vadd.f32 %v1300_v39, %v1863_v22  ;;  %v1303_v29 = vadd.f32 %v1302_v47, %v1301_v63  ;;  %v1059_v49 = vpack.c.bf16 %v1036_v37, %v1035_v21 }
 0x23a   :  { %v1005_v50 = vmul.f32 0.2, %v933_v48  ;;  %v936_v18 = vadd.f32 %v1303_v29, %v1865_v25  ;;  %1340 = vmatprep.subr.bf16.mxu0 %v1059_v49 }
 0x23b   :  { %1341 = vmatpush3.bf16.msra.mxu0 %v1908_v38 }
 0x23c   :  { %v1006_v53 = vmul.f32 0.2, %v936_v18  ;;  %v1304_v20 = vpop.f32.mrb[24].mxu1  ;;  %v1037_v0 = vmax.f32 %v933_v48, %v1005_v50 }
 0x23d   :  { %v1305_v55 = vpop.f32.mrb[25].mxu1 }
 0x23e   :  { %v1038_v23 = vmax.f32 %v936_v18, %v1006_v53  ;;  %v1306_v30 = vadd.f32 %v1305_v55, %v1304_v20  ;;  %v1307_v56 = vpop.f32.mrb[26].mxu1 }
 0x23f   :  { %v1308_v44 = vpop.f32.mrb[27].mxu1 }
 0x240   :  { %v941_v57 = vadd.f32 %v1306_v30, %v1871_v51  ;;  %v1309_v58 = vadd.f32 %v1308_v44, %v1307_v56  ;;  %v1060_v22 = vpack.c.bf16 %v1038_v23, %v1037_v0 }
 0x242   :  { %v1007_v59 = vmul.f32 0.2, %v941_v57  ;;  %v944_v26 = vadd.f32 %v1309_v58, %v1873_v28  ;;  %1342 = vmatprep.subr.bf16.mxu0 %v1060_v22 }
 0x243   :  { %1343 = vmatpush3.bf16.msra.mxu0 %v1919_v8 }
 0x244   :  { %v1008_v25 = vmul.f32 0.2, %v944_v26  ;;  %v1310_v38 = vpop.f32.mrb[28].mxu1  ;;  %v1039_v61 = vmax.f32 %v941_v57, %v1007_v59 }
 0x245   :  { %v1311_v60 = vpop.f32.mrb[29].mxu1 }
 0x246   :  { %v1040_v45 = vmax.f32 %v944_v26, %v1008_v25  ;;  %v1312_v62 = vadd.f32 %v1311_v60, %v1310_v38  ;;  %v1313_v1 = vpop.f32.mrb[30].mxu1 }
 0x247   :  { %v1314_v27 = vpop.f32.mrb[31].mxu1 }
 0x248   :  { %v949_v3 = vadd.f32 %v1312_v62, %v1879_v31  ;;  %v1315_v4 = vadd.f32 %v1314_v27, %v1313_v1  ;;  %v1061_v51 = vpack.c.bf16 %v1040_v45, %v1039_v61 }
 0x24a   :  { %v1009_v7 = vmul.f32 0.2, %v949_v3  ;;  %v952_v9 = vadd.f32 %v1315_v4, %v1881_v32  ;;  %1344 = vmatprep.subr.bf16.mxu0 %v1061_v51  ;;  %v1206_v51 = vcombine.low %v1890_v35, %v1890_v35 }
 0x24b   :  { %1345 = vmatpush3.bf16.msra.mxu0 %v1925_v41 }
 0x24c   :  { %v1010_v28 = vmul.f32 0.2, %v952_v9  ;;  %v1316_v8 = vpop.f32.mrb[32].mxu1  ;;  %v1041_v11 = vmax.f32 %v949_v3, %v1009_v7 }
 0x24d   :  { %v1317_v10 = vpop.f32.mrb[33].mxu1 }
 0x24e   :  { %v1042_v12 = vmax.f32 %v952_v9, %v1010_v28  ;;  %v1318_v13 = vadd.f32 %v1317_v10, %v1316_v8  ;;  %v1319_v15 = vpop.f32.mrb[34].mxu1  ;;  %v1072_v8 = vpop.permute.xlu0 %1071 }
 0x24f   :  { %v1320_v34 = vpop.f32.mrb[35].mxu1 }
 0x250   :  { %v957_v16 = vadd.f32 %v1318_v13, %v1892_v6  ;;  %v1321_v17 = vadd.f32 %v1320_v34, %v1319_v15  ;;  %v1062_v31 = vpack.c.bf16 %v1042_v12, %v1041_v11 }
 0x252   :  { %v1011_v52 = vmul.f32 0.2, %v957_v16  ;;  %v960_v21 = vadd.f32 %v1321_v17, %v1894_v36  ;;  %1346 = vmatprep.subr.bf16.mxu0 %v1062_v31 }
 0x253   :  { %1347 = vmatpush3.bf16.msra.mxu0 %v1054_v14 }
 0x254   :  { %v1012_v32 = vmul.f32 0.2, %v960_v21  ;;  %v1322_v37 = vpop.f32.mrb[36].mxu1  ;;  %v1043_v39 = vmax.f32 %v957_v16, %v1011_v52 }
 0x255   :  { %v1323_v41 = vpop.f32.mrb[37].mxu1 }
 0x256   :  { %v1044_v63 = vmax.f32 %v960_v21, %v1012_v32  ;;  %v1324_v47 = vadd.f32 %v1323_v41, %v1322_v37  ;;  %v1325_v48 = vpop.f32.mrb[38].mxu1 }
 0x257   :  { %v1326_v29 = vpop.f32.mrb[39].mxu1 }
 0x258   :  { %v965_v49 = vadd.f32 %v1324_v47, %v1898_v40  ;;  %v1327_v50 = vadd.f32 %v1326_v29, %v1325_v48  ;;  %v1063_v18 = vpack.c.bf16 %v1044_v63, %v1043_v39 }
 0x25a   :  { %v1013_v6 = vmul.f32 0.2, %v965_v49  ;;  %v968_v53 = vadd.f32 %v1327_v50, %v1900_v43  ;;  %1348 = vmatprep.subr.bf16.mxu0 %v1063_v18 }
 0x25b   :  { %1349 = vmatpush3.bf16.msra.mxu0 %v1906_v19 }
 0x25c   :  { %v1014_v36 = vmul.f32 0.2, %v968_v53  ;;  %v1328_v14 = vpop.f32.mrb[40].mxu1  ;;  %v1045_v55 = vmax.f32 %v965_v49, %v1013_v6 }
 0x25d   :  { %v1329_v20 = vpop.f32.mrb[41].mxu1 }
 0x25e   :  { %v1046_v0 = vmax.f32 %v968_v53, %v1014_v36  ;;  %v1330_v23 = vadd.f32 %v1329_v20, %v1328_v14  ;;  %v1331_v30 = vpop.f32.mrb[42].mxu1 }
 0x25f   :  { %v1332_v56 = vpop.f32.mrb[43].mxu1 }
 0x260   :  { %v973_v44 = vadd.f32 %v1330_v23, %v1902_v5  ;;  %v1333_v57 = vadd.f32 %v1332_v56, %v1331_v30  ;;  %v1064_v40 = vpack.c.bf16 %v1046_v0, %v1045_v55 }
 0x262   :  { %v1015_v58 = vmul.f32 0.2, %v973_v44  ;;  %v976_v22 = vadd.f32 %v1333_v57, %v1904_v46  ;;  %1350 = vmatprep.subr.bf16.mxu0 %v1064_v40 }
 0x263   :  { %1351 = vmatpush3.bf16.msra.mxu0 %v1916_v2 }
 0x264   :  { %v1016_v43 = vmul.f32 0.2, %v976_v22  ;;  %v1334_v19 = vpop.f32.mrb[44].mxu1  ;;  %v1047_v26 = vmax.f32 %v973_v44, %v1015_v58 }
 0x265   :  { %v1335_v59 = vpop.f32.mrb[45].mxu1 }
 0x266   :  { %v1048_v25 = vmax.f32 %v976_v22, %v1016_v43  ;;  %v1336_v38 = vadd.f32 %v1335_v59, %v1334_v19  ;;  %v1337_v60 = vpop.f32.mrb[46].mxu1 }
 0x267   :  { %v1338_v61 = vpop.f32.mrb[47].mxu1 }
 0x268   :  { %v981_v45 = vadd.f32 %v1336_v38, %v1912_v54  ;;  %v1339_v62 = vadd.f32 %v1338_v61, %v1337_v60  ;;  %v1065_v5 = vpack.c.bf16 %v1048_v25, %v1047_v26 }
 0x26a   :  { %v1017_v1 = vmul.f32 0.2, %v981_v45  ;;  %v984_v27 = vadd.f32 %v1339_v62, %v1914_v24  ;;  %1352 = vmatprep.subr.bf16.mxu0 %v1065_v5 }
 0x26b   :  { %1353 = vmatpush3.bf16.msra.mxu0 %v1922_v42 }
 0x26c   :  { %v1018_v46 = vmul.f32 0.2, %v984_v27  ;;  %v1049_v2 = vmax.f32 %v981_v45, %v1017_v1 }
 0x26e   :  { %v1050_v3 = vmax.f32 %v984_v27, %v1018_v46 }
 0x270   :  { %v1066_v4 = vpack.c.bf16 %v1050_v3, %v1049_v2 }
 0x272   :  { %1354 = vmatprep.subr.bf16.mxu0 %v1066_v4 }
 0x273   :  { %1355 = vmatpush3.bf16.msra.mxu0 %v1928_v33 }
 0x276   :  { %1114 = vmatmul.mubr.bf16.vlgmr.msra.gmra.mrb[48].mxu0 %v1206_v51 }
 0x349   :  { %v1356_v54 = vpop.f32.mrb[48].mxu0 }
 0x34a   :  { %v1357_v7 = vpop.f32.mrb[49].mxu0 }
 0x34b   :  { %v1358_v9 = vadd.f32 %v1357_v7, %v1356_v54  ;;  %v1359_v28 = vpop.f32.mrb[50].mxu0 }
 0x34c   :  { %v1360_v24 = vpop.f32.mrb[51].mxu0 }
 0x34d   :  { %v1116_v10 = vadd.f32 %v1358_v9, %v1072_v8 }
 0x34f   :  { %v1208_v11 = vmul.f32 -1.442695, %v1116_v10 }
 0x351   :  { %1491 = vpow2.f32 %v1208_v11 }
 0x35b   :  { %v1492_v42 = vpop.eup %1491 }
 0x35c   :  { %v1124_v12 = vadd.f32 1.0, %v1492_v42 }
 0x35e   :  { %1493 = vrcp.f32 %v1124_v12 }
 0x368   :  { %v1494_v13 = vpop.eup %1493 }
 0x369   :  { %1127 = vst [vmem:[#allocation2] sm:$0xff] %v1494_v13 }
 0x36a   :  { %1506 = shalt.err (!%p1503_p4)
}
 0x36b   :  { %s1507_s9 = scalar_lea.hbm %s1974_s7, 128 }
 0x36c   :  { %p1508_p5 = scmp.ne.s32.totalorder %s1974_s7, %s1507_s9  ;;  %p1511_p6 = scmp.lt.u32.totalorder %s1507_s9, %s1974_s7 }
 0x36e   :  { %p1513_p7 = pnand %p1511_p6, %p1508_p5 }
 0x370   :  { %1516 = shalt.err (!%p1513_p7)
}
 0x371   :  { %1137 = dma.vmem_to_hbm [thread:$0]  %s1135_s0, 128, %s1974_s7, [#allocation3]  }
 0x372   :  { %1517 = dma.done.wait [#allocation3], 128  }
 0x373   :  { %1518 = vsyncadd [#allocation3], 4294967168 }
 0x374   :  { %1141 = vsyncpa [#allocation3], 1 }

</bundles_post_ra>
